<compile_context>
chip_gen: v5e
topology: v5e:2x2
jax: 0.10.0
libtpu: 0.0.40
codegen_flags: <defaults>
</compile_context>

<pallas_src>
import jax
import jax.numpy as jnp
from jax import lax
from jax.experimental import pallas as pl
from jax.experimental.pallas import tpu as pltpu


def _round_up(x, m):
    return ((x + m - 1) // m) * m


def _layer_norm(x, gamma, beta, eps=1e-5):
    mu = jnp.mean(x, axis=-1, keepdims=True)
    var = jnp.mean((x - mu) * (x - mu), axis=-1, keepdims=True)
    return (x - mu) * lax.rsqrt(var + eps) * gamma + beta


def dueling_kernel(
    x_ref,
    # trunk: Linear(8,128) ReLU, Linear(128,256) ReLU, Linear(256,16) ReLU
    w1, b1, w2, b2, w3, b3,
    # fused branch entry: [vw1 | aw1] -> [16,128], [vb1 | ab1] -> [1,128], LN(64)
    wb1, bb1, ln1_g, ln1_b,
    # value branch tail: Linear(64,128) ReLU, then N=1 head as a VPU row-dot
    vw2, vb2, vw3_row, vb3,
    # advantage branch tail: Linear(64,128), LN(128), Linear(128,4, pre-centered)
    aw2, ab2, ln2_g, ln2_b, aw3c,
    out_ref,
):
    f32 = jnp.float32
    bf16 = jnp.bfloat16

    def mm(a, w_ref):
        # MXU matmul: bf16 operands, f32 accumulation.
        return jnp.dot(a.astype(bf16), w_ref[...], preferred_element_type=f32)

    x = x_ref[...].astype(f32)

    # ---- shared trunk ----
    h = jnp.maximum(mm(x, w1) + b1[...], 0.0)
    h = jnp.maximum(mm(h, w2) + b2[...], 0.0)
    h = jnp.maximum(mm(h, w3) + b3[...], 0.0)                       # [TB, 16]

    # ---- fused branch entry: one lane-dense [TB,128] = [v_in(64) | a_in(64)] ----
    hb = mm(h, wb1) + bb1[...]
    v = jnp.maximum(hb[:, :64], 0.0)                                # value half (ReLU)
    a = hb[:, 64:]                                                  # advantage half (pre-LN)

    # ---- value branch ----
    v = jnp.maximum(mm(v, vw2) + vb2[...], 0.0)                     # [TB, 128]
    # N=1 head: VPU multiply + lane reduction instead of a wasted MXU push.
    v = jnp.sum(v * vw3_row[...], axis=-1, keepdims=True) + vb3[...]  # [TB, 1]

    # ---- advantage branch ----
    a = jnp.maximum(_layer_norm(a, ln1_g[...], ln1_b[...]), 0.0)
    a = mm(a, aw2) + ab2[...]                                       # [TB, 128]
    a = _layer_norm(a, ln2_g[...], ln2_b[...])
    a = mm(a, aw3c)                                                 # [TB, 4] (already centered)

    out_ref[...] = (a + v).astype(out_ref.dtype)


def pack_params(params):
    """Fuse / preprocess PyTorch-equivalent params for the kernel (order matters)."""
    bf16, f32 = jnp.bfloat16, jnp.float32
    wb1 = jnp.concatenate([params["vw1"], params["aw1"]], axis=1)        # [16, 128]
    bb1 = jnp.concatenate([params["vb1"], params["ab1"]], axis=1)        # [1, 128]
    # Fold the "(a.T - a.mean(-1)).T" centering into the bias-free head weight.
    aw3c = params["aw3"] - jnp.mean(params["aw3"], axis=1, keepdims=True)
    return [
        params["w1"].astype(bf16), params["b1"].astype(f32),
        params["w2"].astype(bf16), params["b2"].astype(f32),
        params["w3"].astype(bf16), params["b3"].astype(f32),
        wb1.astype(bf16), bb1.astype(f32),
        params["ln1_g"].astype(f32), params["ln1_b"].astype(f32),
        params["vw2"].astype(bf16), params["vb2"].astype(f32),
        params["vw3"].T.astype(f32),          # [1, 128] row for the VPU value head
        params["vb3"].astype(f32),            # [1, 1]
        params["aw2"].astype(bf16), params["ab2"].astype(f32),
        params["ln2_g"].astype(f32), params["ln2_b"].astype(f32),
        aw3c.astype(bf16),
    ]


def dueling_net_forward(state, params, *, block_b=1024):
    """state: [B, 8] float32. params: dict of weights. Returns [B, 4] float32."""
    B = state.shape[0]
    packed = pack_params(params)

    # Batch tile: multiple of 8 (sublane), capped at block_b (safe for v5e/v6e/v7x
    # scoped VMEM defaults: ~TB * 3 KB of activations + ~150 KB resident weights).
    TB = min(_round_up(B, 8), _round_up(block_b, 8))
    Bp = _round_up(B, TB)
    if Bp != B:
        state = jnp.pad(state, ((0, Bp - B), (0, 0)))

    grid = (Bp // TB,)
    x_spec = pl.BlockSpec((TB, 8), lambda i: (i, 0))
    out_spec = pl.BlockSpec((TB, 4), lambda i: (i, 0))
    # Full-array blocks with a constant block index: fetched once, VMEM-resident.
    w_specs = [pl.BlockSpec(p.shape, lambda i: (0, 0)) for p in packed]

    macs_per_row = 8 * 128 + 128 * 256 + 256 * 16 + 16 * 128 + 64 * 128 + 128 + 64 * 128 + 128 * 4
    cost = pl.CostEstimate(
        flops=2 * macs_per_row * Bp,
        transcendentals=2 * Bp,  # two rsqrt per row (LayerNorms)
        bytes_accessed=Bp * (8 + 4) * 4 + sum(int(p.size) * p.dtype.itemsize for p in packed),
    )

    out = pl.pallas_call(
        dueling_kernel,
        out_shape=jax.ShapeDtypeStruct((Bp, 4), jnp.float32),
        grid_spec=pltpu.PrefetchScalarGridSpec(
            num_scalar_prefetch=0,
            grid=grid,
            in_specs=[x_spec] + w_specs,
            out_specs=out_spec,
        ),
        compiler_params=pltpu.CompilerParams(
            dimension_semantics=("parallel",),
        ),
        cost_estimate=cost,
    )(state, *packed)
    return out[:B]


def dueling_net_reference(state, params):
    """Pure-JAX f32 reference matching the PyTorch forward."""
    def ln(x, g, b, eps=1e-5):
        mu = x.mean(-1, keepdims=True)
        var = ((x - mu) ** 2).mean(-1, keepdims=True)
        return (x - mu) / jnp.sqrt(var + eps) * g + b

    relu = lambda z: jnp.maximum(z, 0.0)
    h = relu(state @ params["w1"] + params["b1"])
    h = relu(h @ params["w2"] + params["b2"])
    h = relu(h @ params["w3"] + params["b3"])
    v = relu(h @ params["vw1"] + params["vb1"])
    v = relu(v @ params["vw2"] + params["vb2"])
    v = v @ params["vw3"] + params["vb3"]
    a = h @ params["aw1"] + params["ab1"]
    a = relu(ln(a, params["ln1_g"], params["ln1_b"]))
    a = a @ params["aw2"] + params["ab2"]
    a = ln(a, params["ln2_g"], params["ln2_b"])
    a = a @ params["aw3"]
    a = a - a.mean(-1, keepdims=True)
    return a + v


def init_params(key):
    """Deterministic init. Linear weights stored [in, out], PyTorch-style
    uniform(-1/sqrt(in), 1/sqrt(in)); LayerNorm gamma=1, beta=0."""
    params = {}

    def linear(key, names, fan_in, fan_out, bias=True):
        kw, kb = jax.random.split(key)
        bound = 1.0 / jnp.sqrt(jnp.float32(fan_in))
        params[names[0]] = jax.random.uniform(
            kw, (fan_in, fan_out), jnp.float32, -bound, bound)
        if bias:
            params[names[1]] = jax.random.uniform(
                kb, (1, fan_out), jnp.float32, -bound, bound)

    keys = jax.random.split(key, 9)
    # trunk
    linear(keys[0], ("w1", "b1"), 8, 128)
    linear(keys[1], ("w2", "b2"), 128, 256)
    linear(keys[2], ("w3", "b3"), 256, 16)
    # v_net
    linear(keys[3], ("vw1", "vb1"), 16, 64)
    linear(keys[4], ("vw2", "vb2"), 64, 128)
    linear(keys[5], ("vw3", "vb3"), 128, 1)
    # a_net
    linear(keys[6], ("aw1", "ab1"), 16, 64)
    params["ln1_g"] = jnp.ones((1, 64), jnp.float32)
    params["ln1_b"] = jnp.zeros((1, 64), jnp.float32)
    linear(keys[7], ("aw2", "ab2"), 64, 128)
    params["ln2_g"] = jnp.ones((1, 128), jnp.float32)
    params["ln2_b"] = jnp.zeros((1, 128), jnp.float32)
    linear(keys[8], ("aw3", None), 128, 4, bias=False)
    return params


if __name__ == "__main__":
    key = jax.random.PRNGKey(0)
    k_params, k_state = jax.random.split(key)
    params = init_params(k_params)

    B = 2
    state = jax.random.normal(k_state, (B, 8), jnp.float32)

    out = dueling_net_forward(state, params)
    out = jax.block_until_ready(out)
    assert out.shape == (B, 4) and out.dtype == jnp.float32
    assert bool(jnp.all(jnp.isfinite(out)))

    # Loose check against the f32 reference (kernel uses bf16 MXU operands).
    ref = dueling_net_reference(state, params)
    max_err = float(jnp.max(jnp.abs(out - ref)))
    assert max_err < 0.2, f"kernel/reference mismatch: {max_err}"

    print("KERNEL_OK")
</pallas_src>

<mosaic_0001>
module attributes {stable_mosaic.version = 11 : i64} {
  func.func @dueling_kernel(%arg0: i32, %arg1: memref<8x8xf32, #tpu.memory_space<vmem>>, %arg2: memref<8x128xbf16, #tpu.memory_space<vmem>>, %arg3: memref<1x128xf32, #tpu.memory_space<vmem>>, %arg4: memref<128x256xbf16, #tpu.memory_space<vmem>>, %arg5: memref<1x256xf32, #tpu.memory_space<vmem>>, %arg6: memref<256x16xbf16, #tpu.memory_space<vmem>>, %arg7: memref<1x16xf32, #tpu.memory_space<vmem>>, %arg8: memref<16x128xbf16, #tpu.memory_space<vmem>>, %arg9: memref<1x128xf32, #tpu.memory_space<vmem>>, %arg10: memref<1x64xf32, #tpu.memory_space<vmem>>, %arg11: memref<1x64xf32, #tpu.memory_space<vmem>>, %arg12: memref<64x128xbf16, #tpu.memory_space<vmem>>, %arg13: memref<1x128xf32, #tpu.memory_space<vmem>>, %arg14: memref<1x128xf32, #tpu.memory_space<vmem>>, %arg15: memref<1x1xf32, #tpu.memory_space<vmem>>, %arg16: memref<64x128xbf16, #tpu.memory_space<vmem>>, %arg17: memref<1x128xf32, #tpu.memory_space<vmem>>, %arg18: memref<1x128xf32, #tpu.memory_space<vmem>>, %arg19: memref<1x128xf32, #tpu.memory_space<vmem>>, %arg20: memref<128x4xbf16, #tpu.memory_space<vmem>>, %arg21: memref<8x4xf32, #tpu.memory_space<vmem>>) attributes {dimension_semantics = [#tpu.dimension_semantics<parallel>], iteration_bounds = array<i64: 1>, scalar_prefetch = 0 : i64, scratch_operands = 0 : i64, tpu.core_type = #tpu.core_type<tc>, window_params = [{transform_indices = @transform_0, window_bounds = array<i64: 8, 8>}, {pipeline_mode = #tpu.pipeline_mode<synchronous>, transform_indices = @transform_1, window_bounds = array<i64: 8, 128>}, {pipeline_mode = #tpu.pipeline_mode<synchronous>, transform_indices = @transform_2, window_bounds = array<i64: 1, 128>}, {pipeline_mode = #tpu.pipeline_mode<synchronous>, transform_indices = @transform_3, window_bounds = array<i64: 128, 256>}, {pipeline_mode = #tpu.pipeline_mode<synchronous>, transform_indices = @transform_4, window_bounds = array<i64: 1, 256>}, {pipeline_mode = #tpu.pipeline_mode<synchronous>, transform_indices = @transform_5, window_bounds = array<i64: 256, 16>}, {pipeline_mode = #tpu.pipeline_mode<synchronous>, transform_indices = @transform_6, window_bounds = array<i64: 1, 16>}, {pipeline_mode = #tpu.pipeline_mode<synchronous>, transform_indices = @transform_7, window_bounds = array<i64: 16, 128>}, {pipeline_mode = #tpu.pipeline_mode<synchronous>, transform_indices = @transform_8, window_bounds = array<i64: 1, 128>}, {pipeline_mode = #tpu.pipeline_mode<synchronous>, transform_indices = @transform_9, window_bounds = array<i64: 1, 64>}, {pipeline_mode = #tpu.pipeline_mode<synchronous>, transform_indices = @transform_10, window_bounds = array<i64: 1, 64>}, {pipeline_mode = #tpu.pipeline_mode<synchronous>, transform_indices = @transform_11, window_bounds = array<i64: 64, 128>}, {pipeline_mode = #tpu.pipeline_mode<synchronous>, transform_indices = @transform_12, window_bounds = array<i64: 1, 128>}, {pipeline_mode = #tpu.pipeline_mode<synchronous>, transform_indices = @transform_13, window_bounds = array<i64: 1, 128>}, {pipeline_mode = #tpu.pipeline_mode<synchronous>, transform_indices = @transform_14, window_bounds = array<i64: 1, 1>}, {pipeline_mode = #tpu.pipeline_mode<synchronous>, transform_indices = @transform_15, window_bounds = array<i64: 64, 128>}, {pipeline_mode = #tpu.pipeline_mode<synchronous>, transform_indices = @transform_16, window_bounds = array<i64: 1, 128>}, {pipeline_mode = #tpu.pipeline_mode<synchronous>, transform_indices = @transform_17, window_bounds = array<i64: 1, 128>}, {pipeline_mode = #tpu.pipeline_mode<synchronous>, transform_indices = @transform_18, window_bounds = array<i64: 1, 128>}, {pipeline_mode = #tpu.pipeline_mode<synchronous>, transform_indices = @transform_19, window_bounds = array<i64: 128, 4>}, {transform_indices = @transform_20, window_bounds = array<i64: 8, 4>}]} {
    %c0 = arith.constant 0 : index
    %c0_0 = arith.constant 0 : index
    %0 = vector.load %arg1[%c0, %c0_0] : memref<8x8xf32, #tpu.memory_space<vmem>>, vector<8x8xf32>
    %1 = arith.truncf %0 : vector<8x8xf32> to vector<8x8xbf16>
    %c0_1 = arith.constant 0 : index
    %c0_2 = arith.constant 0 : index
    %2 = vector.load %arg2[%c0_1, %c0_2] : memref<8x128xbf16, #tpu.memory_space<vmem>>, vector<8x128xbf16>
    %cst = arith.constant dense<0.000000e+00> : vector<8x128xf32>
    %3 = tpu.matmul %1, %2, %cst {dimension_numbers = #tpu.dot_dimension_numbers<[1], [0], [0], [1], [0, 0, 1, 1], [], []>} : vector<8x8xbf16>, vector<8x128xbf16>, vector<8x128xf32> -> vector<8x128xf32>
    %c0_3 = arith.constant 0 : index
    %c0_4 = arith.constant 0 : index
    %4 = vector.load %arg3[%c0_3, %c0_4] : memref<1x128xf32, #tpu.memory_space<vmem>>, vector<1x128xf32>
    %5 = vector.broadcast %4 : vector<1x128xf32> to vector<8x128xf32>
    %6 = arith.addf %3, %5 : vector<8x128xf32>
    %cst_5 = arith.constant 0.000000e+00 : f32
    %7 = vector.broadcast %cst_5 : f32 to vector<8x128xf32>
    %8 = arith.maximumf %6, %7 : vector<8x128xf32>
    %9 = arith.truncf %8 : vector<8x128xf32> to vector<8x128xbf16>
    %c0_6 = arith.constant 0 : index
    %c0_7 = arith.constant 0 : index
    %10 = vector.load %arg4[%c0_6, %c0_7] : memref<128x256xbf16, #tpu.memory_space<vmem>>, vector<128x256xbf16>
    %cst_8 = arith.constant dense<0.000000e+00> : vector<8x256xf32>
    %11 = tpu.matmul %9, %10, %cst_8 {dimension_numbers = #tpu.dot_dimension_numbers<[1], [0], [0], [1], [0, 0, 1, 1], [], []>} : vector<8x128xbf16>, vector<128x256xbf16>, vector<8x256xf32> -> vector<8x256xf32>
    %c0_9 = arith.constant 0 : index
    %c0_10 = arith.constant 0 : index
    %12 = vector.load %arg5[%c0_9, %c0_10] : memref<1x256xf32, #tpu.memory_space<vmem>>, vector<1x256xf32>
    %13 = vector.broadcast %12 : vector<1x256xf32> to vector<8x256xf32>
    %14 = arith.addf %11, %13 : vector<8x256xf32>
    %cst_11 = arith.constant 0.000000e+00 : f32
    %15 = vector.broadcast %cst_11 : f32 to vector<8x256xf32>
    %16 = arith.maximumf %14, %15 : vector<8x256xf32>
    %17 = arith.truncf %16 : vector<8x256xf32> to vector<8x256xbf16>
    %c0_12 = arith.constant 0 : index
    %c0_13 = arith.constant 0 : index
    %18 = vector.load %arg6[%c0_12, %c0_13] : memref<256x16xbf16, #tpu.memory_space<vmem>>, vector<256x16xbf16>
    %cst_14 = arith.constant dense<0.000000e+00> : vector<8x16xf32>
    %19 = tpu.matmul %17, %18, %cst_14 {dimension_numbers = #tpu.dot_dimension_numbers<[1], [0], [0], [1], [0, 0, 1, 1], [], []>} : vector<8x256xbf16>, vector<256x16xbf16>, vector<8x16xf32> -> vector<8x16xf32>
    %c0_15 = arith.constant 0 : index
    %c0_16 = arith.constant 0 : index
    %20 = vector.load %arg7[%c0_15, %c0_16] : memref<1x16xf32, #tpu.memory_space<vmem>>, vector<1x16xf32>
    %21 = vector.broadcast %20 : vector<1x16xf32> to vector<8x16xf32>
    %22 = arith.addf %19, %21 : vector<8x16xf32>
    %cst_17 = arith.constant 0.000000e+00 : f32
    %23 = vector.broadcast %cst_17 : f32 to vector<8x16xf32>
    %24 = arith.maximumf %22, %23 : vector<8x16xf32>
    %25 = arith.truncf %24 : vector<8x16xf32> to vector<8x16xbf16>
    %c0_18 = arith.constant 0 : index
    %c0_19 = arith.constant 0 : index
    %26 = vector.load %arg8[%c0_18, %c0_19] : memref<16x128xbf16, #tpu.memory_space<vmem>>, vector<16x128xbf16>
    %cst_20 = arith.constant dense<0.000000e+00> : vector<8x128xf32>
    %27 = tpu.matmul %25, %26, %cst_20 {dimension_numbers = #tpu.dot_dimension_numbers<[1], [0], [0], [1], [0, 0, 1, 1], [], []>} : vector<8x16xbf16>, vector<16x128xbf16>, vector<8x128xf32> -> vector<8x128xf32>
    %c0_21 = arith.constant 0 : index
    %c0_22 = arith.constant 0 : index
    %28 = vector.load %arg9[%c0_21, %c0_22] : memref<1x128xf32, #tpu.memory_space<vmem>>, vector<1x128xf32>
    %29 = vector.broadcast %28 : vector<1x128xf32> to vector<8x128xf32>
    %30 = arith.addf %27, %29 : vector<8x128xf32>
    %31 = vector.extract_strided_slice %30 {offsets = [0, 0], sizes = [8, 64], strides = [1, 1]} : vector<8x128xf32> to vector<8x64xf32>
    %cst_23 = arith.constant 0.000000e+00 : f32
    %32 = vector.broadcast %cst_23 : f32 to vector<8x64xf32>
    %33 = arith.maximumf %31, %32 : vector<8x64xf32>
    %34 = vector.extract_strided_slice %30 {offsets = [0, 64], sizes = [8, 64], strides = [1, 1]} : vector<8x128xf32> to vector<8x64xf32>
    %35 = arith.truncf %33 : vector<8x64xf32> to vector<8x64xbf16>
    %c0_24 = arith.constant 0 : index
    %c0_25 = arith.constant 0 : index
    %36 = vector.load %arg12[%c0_24, %c0_25] : memref<64x128xbf16, #tpu.memory_space<vmem>>, vector<64x128xbf16>
    %cst_26 = arith.constant dense<0.000000e+00> : vector<8x128xf32>
    %37 = tpu.matmul %35, %36, %cst_26 {dimension_numbers = #tpu.dot_dimension_numbers<[1], [0], [0], [1], [0, 0, 1, 1], [], []>} : vector<8x64xbf16>, vector<64x128xbf16>, vector<8x128xf32> -> vector<8x128xf32>
    %c0_27 = arith.constant 0 : index
    %c0_28 = arith.constant 0 : index
    %38 = vector.load %arg13[%c0_27, %c0_28] : memref<1x128xf32, #tpu.memory_space<vmem>>, vector<1x128xf32>
    %39 = vector.broadcast %38 : vector<1x128xf32> to vector<8x128xf32>
    %40 = arith.addf %37, %39 : vector<8x128xf32>
    %cst_29 = arith.constant 0.000000e+00 : f32
    %41 = vector.broadcast %cst_29 : f32 to vector<8x128xf32>
    %42 = arith.maximumf %40, %41 : vector<8x128xf32>
    %c0_30 = arith.constant 0 : index
    %c0_31 = arith.constant 0 : index
    %43 = vector.load %arg14[%c0_30, %c0_31] : memref<1x128xf32, #tpu.memory_space<vmem>>, vector<1x128xf32>
    %44 = vector.broadcast %43 : vector<1x128xf32> to vector<8x128xf32>
    %45 = arith.mulf %42, %44 : vector<8x128xf32>
    %cst_32 = arith.constant dense<0.000000e+00> : vector<8xf32>
    %46 = vector.multi_reduction <add>, %45, %cst_32 [1] : vector<8x128xf32> to vector<8xf32>
    %47 = vector.shape_cast %46 : vector<8xf32> to vector<8x1xf32>
    %c0_33 = arith.constant 0 : index
    %c0_34 = arith.constant 0 : index
    %48 = vector.load %arg15[%c0_33, %c0_34] : memref<1x1xf32, #tpu.memory_space<vmem>>, vector<1x1xf32>
    %49 = vector.broadcast %48 : vector<1x1xf32> to vector<8x1xf32>
    %50 = arith.addf %47, %49 : vector<8x1xf32>
    %c0_35 = arith.constant 0 : index
    %c0_36 = arith.constant 0 : index
    %51 = vector.load %arg10[%c0_35, %c0_36] : memref<1x64xf32, #tpu.memory_space<vmem>>, vector<1x64xf32>
    %c0_37 = arith.constant 0 : index
    %c0_38 = arith.constant 0 : index
    %52 = vector.load %arg11[%c0_37, %c0_38] : memref<1x64xf32, #tpu.memory_space<vmem>>, vector<1x64xf32>
    %cst_39 = arith.constant dense<0.000000e+00> : vector<8xf32>
    %53 = vector.multi_reduction <add>, %34, %cst_39 [1] : vector<8x64xf32> to vector<8xf32>
    %54 = vector.shape_cast %53 : vector<8xf32> to vector<8x1xf32>
    %cst_40 = arith.constant 6.400000e+01 : f32
    %55 = vector.broadcast %cst_40 : f32 to vector<8x1xf32>
    %56 = arith.divf %54, %55 : vector<8x1xf32>
    %57 = vector.broadcast %56 : vector<8x1xf32> to vector<8x64xf32>
    %58 = arith.subf %34, %57 : vector<8x64xf32>
    %59 = vector.broadcast %56 : vector<8x1xf32> to vector<8x64xf32>
    %60 = arith.subf %34, %59 : vector<8x64xf32>
    %61 = arith.mulf %58, %60 : vector<8x64xf32>
    %cst_41 = arith.constant dense<0.000000e+00> : vector<8xf32>
    %62 = vector.multi_reduction <add>, %61, %cst_41 [1] : vector<8x64xf32> to vector<8xf32>
    %63 = vector.shape_cast %62 : vector<8xf32> to vector<8x1xf32>
    %cst_42 = arith.constant 6.400000e+01 : f32
    %64 = vector.broadcast %cst_42 : f32 to vector<8x1xf32>
    %65 = arith.divf %63, %64 : vector<8x1xf32>
    %66 = vector.broadcast %56 : vector<8x1xf32> to vector<8x64xf32>
    %67 = arith.subf %34, %66 : vector<8x64xf32>
    %cst_43 = arith.constant 9.99999974E-6 : f32
    %68 = vector.broadcast %cst_43 : f32 to vector<8x1xf32>
    %69 = arith.addf %65, %68 : vector<8x1xf32>
    %70 = math.rsqrt %69 : vector<8x1xf32>
    %71 = vector.broadcast %70 : vector<8x1xf32> to vector<8x64xf32>
    %72 = arith.mulf %67, %71 : vector<8x64xf32>
    %73 = vector.broadcast %51 : vector<1x64xf32> to vector<8x64xf32>
    %74 = arith.mulf %72, %73 : vector<8x64xf32>
    %75 = vector.broadcast %52 : vector<1x64xf32> to vector<8x64xf32>
    %76 = arith.addf %74, %75 : vector<8x64xf32>
    %cst_44 = arith.constant 0.000000e+00 : f32
    %77 = vector.broadcast %cst_44 : f32 to vector<8x64xf32>
    %78 = arith.maximumf %76, %77 : vector<8x64xf32>
    %79 = arith.truncf %78 : vector<8x64xf32> to vector<8x64xbf16>
    %c0_45 = arith.constant 0 : index
    %c0_46 = arith.constant 0 : index
    %80 = vector.load %arg16[%c0_45, %c0_46] : memref<64x128xbf16, #tpu.memory_space<vmem>>, vector<64x128xbf16>
    %cst_47 = arith.constant dense<0.000000e+00> : vector<8x128xf32>
    %81 = tpu.matmul %79, %80, %cst_47 {dimension_numbers = #tpu.dot_dimension_numbers<[1], [0], [0], [1], [0, 0, 1, 1], [], []>} : vector<8x64xbf16>, vector<64x128xbf16>, vector<8x128xf32> -> vector<8x128xf32>
    %c0_48 = arith.constant 0 : index
    %c0_49 = arith.constant 0 : index
    %82 = vector.load %arg17[%c0_48, %c0_49] : memref<1x128xf32, #tpu.memory_space<vmem>>, vector<1x128xf32>
    %83 = vector.broadcast %82 : vector<1x128xf32> to vector<8x128xf32>
    %84 = arith.addf %81, %83 : vector<8x128xf32>
    %c0_50 = arith.constant 0 : index
    %c0_51 = arith.constant 0 : index
    %85 = vector.load %arg18[%c0_50, %c0_51] : memref<1x128xf32, #tpu.memory_space<vmem>>, vector<1x128xf32>
    %c0_52 = arith.constant 0 : index
    %c0_53 = arith.constant 0 : index
    %86 = vector.load %arg19[%c0_52, %c0_53] : memref<1x128xf32, #tpu.memory_space<vmem>>, vector<1x128xf32>
    %cst_54 = arith.constant dense<0.000000e+00> : vector<8xf32>
    %87 = vector.multi_reduction <add>, %84, %cst_54 [1] : vector<8x128xf32> to vector<8xf32>
    %88 = vector.shape_cast %87 : vector<8xf32> to vector<8x1xf32>
    %cst_55 = arith.constant 1.280000e+02 : f32
    %89 = vector.broadcast %cst_55 : f32 to vector<8x1xf32>
    %90 = arith.divf %88, %89 : vector<8x1xf32>
    %91 = vector.broadcast %90 : vector<8x1xf32> to vector<8x128xf32>
    %92 = arith.subf %84, %91 : vector<8x128xf32>
    %93 = vector.broadcast %90 : vector<8x1xf32> to vector<8x128xf32>
    %94 = arith.subf %84, %93 : vector<8x128xf32>
    %95 = arith.mulf %92, %94 : vector<8x128xf32>
    %cst_56 = arith.constant dense<0.000000e+00> : vector<8xf32>
    %96 = vector.multi_reduction <add>, %95, %cst_56 [1] : vector<8x128xf32> to vector<8xf32>
    %97 = vector.shape_cast %96 : vector<8xf32> to vector<8x1xf32>
    %cst_57 = arith.constant 1.280000e+02 : f32
    %98 = vector.broadcast %cst_57 : f32 to vector<8x1xf32>
    %99 = arith.divf %97, %98 : vector<8x1xf32>
    %100 = vector.broadcast %90 : vector<8x1xf32> to vector<8x128xf32>
    %101 = arith.subf %84, %100 : vector<8x128xf32>
    %cst_58 = arith.constant 9.99999974E-6 : f32
    %102 = vector.broadcast %cst_58 : f32 to vector<8x1xf32>
    %103 = arith.addf %99, %102 : vector<8x1xf32>
    %104 = math.rsqrt %103 : vector<8x1xf32>
    %105 = vector.broadcast %104 : vector<8x1xf32> to vector<8x128xf32>
    %106 = arith.mulf %101, %105 : vector<8x128xf32>
    %107 = vector.broadcast %85 : vector<1x128xf32> to vector<8x128xf32>
    %108 = arith.mulf %106, %107 : vector<8x128xf32>
    %109 = vector.broadcast %86 : vector<1x128xf32> to vector<8x128xf32>
    %110 = arith.addf %108, %109 : vector<8x128xf32>
    %111 = arith.truncf %110 : vector<8x128xf32> to vector<8x128xbf16>
    %c0_59 = arith.constant 0 : index
    %c0_60 = arith.constant 0 : index
    %112 = vector.load %arg20[%c0_59, %c0_60] : memref<128x4xbf16, #tpu.memory_space<vmem>>, vector<128x4xbf16>
    %cst_61 = arith.constant dense<0.000000e+00> : vector<8x4xf32>
    %113 = tpu.matmul %111, %112, %cst_61 {dimension_numbers = #tpu.dot_dimension_numbers<[1], [0], [0], [1], [0, 0, 1, 1], [], []>} : vector<8x128xbf16>, vector<128x4xbf16>, vector<8x4xf32> -> vector<8x4xf32>
    %114 = vector.broadcast %50 : vector<8x1xf32> to vector<8x4xf32>
    %115 = arith.addf %113, %114 : vector<8x4xf32>
    %c0_62 = arith.constant 0 : index
    %c0_63 = arith.constant 0 : index
    %116 = vector.load %arg21[%c0_62, %c0_63] : memref<8x4xf32, #tpu.memory_space<vmem>>, vector<8x4xf32>
    tpu.vector_store %arg21[%c0_62, %c0_63], %115 {strides = array<i32>} : memref<8x4xf32, #tpu.memory_space<vmem>>, vector<8x4xf32>,
    return
  }
  func.func @transform_0(%arg0: i32) -> (i32, i32) {
    %c0_i32 = arith.constant 0 : i32
    %c0_i32_0 = arith.constant 0 : i32
    return %arg0, %c0_i32 : i32, i32
  }
  func.func @transform_1(%arg0: i32) -> (i32, i32) {
    %c0_i32 = arith.constant 0 : i32
    %c0_i32_0 = arith.constant 0 : i32
    %c0_i32_1 = arith.constant 0 : i32
    return %c0_i32, %c0_i32_0 : i32, i32
  }
  func.func @transform_2(%arg0: i32) -> (i32, i32) {
    %c0_i32 = arith.constant 0 : i32
    %c0_i32_0 = arith.constant 0 : i32
    %c0_i32_1 = arith.constant 0 : i32
    return %c0_i32, %c0_i32_0 : i32, i32
  }
  func.func @transform_3(%arg0: i32) -> (i32, i32) {
    %c0_i32 = arith.constant 0 : i32
    %c0_i32_0 = arith.constant 0 : i32
    %c0_i32_1 = arith.constant 0 : i32
    return %c0_i32, %c0_i32_0 : i32, i32
  }
  func.func @transform_4(%arg0: i32) -> (i32, i32) {
    %c0_i32 = arith.constant 0 : i32
    %c0_i32_0 = arith.constant 0 : i32
    %c0_i32_1 = arith.constant 0 : i32
    return %c0_i32, %c0_i32_0 : i32, i32
  }
  func.func @transform_5(%arg0: i32) -> (i32, i32) {
    %c0_i32 = arith.constant 0 : i32
    %c0_i32_0 = arith.constant 0 : i32
    %c0_i32_1 = arith.constant 0 : i32
    return %c0_i32, %c0_i32_0 : i32, i32
  }
  func.func @transform_6(%arg0: i32) -> (i32, i32) {
    %c0_i32 = arith.constant 0 : i32
    %c0_i32_0 = arith.constant 0 : i32
    %c0_i32_1 = arith.constant 0 : i32
    return %c0_i32, %c0_i32_0 : i32, i32
  }
  func.func @transform_7(%arg0: i32) -> (i32, i32) {
    %c0_i32 = arith.constant 0 : i32
    %c0_i32_0 = arith.constant 0 : i32
    %c0_i32_1 = arith.constant 0 : i32
    return %c0_i32, %c0_i32_0 : i32, i32
  }
  func.func @transform_8(%arg0: i32) -> (i32, i32) {
    %c0_i32 = arith.constant 0 : i32
    %c0_i32_0 = arith.constant 0 : i32
    %c0_i32_1 = arith.constant 0 : i32
    return %c0_i32, %c0_i32_0 : i32, i32
  }
  func.func @transform_9(%arg0: i32) -> (i32, i32) {
    %c0_i32 = arith.constant 0 : i32
    %c0_i32_0 = arith.constant 0 : i32
    %c0_i32_1 = arith.constant 0 : i32
    return %c0_i32, %c0_i32_0 : i32, i32
  }
  func.func @transform_10(%arg0: i32) -> (i32, i32) {
    %c0_i32 = arith.constant 0 : i32
    %c0_i32_0 = arith.constant 0 : i32
    %c0_i32_1 = arith.constant 0 : i32
    return %c0_i32, %c0_i32_0 : i32, i32
  }
  func.func @transform_11(%arg0: i32) -> (i32, i32) {
    %c0_i32 = arith.constant 0 : i32
    %c0_i32_0 = arith.constant 0 : i32
    %c0_i32_1 = arith.constant 0 : i32
    return %c0_i32, %c0_i32_0 : i32, i32
  }
  func.func @transform_12(%arg0: i32) -> (i32, i32) {
    %c0_i32 = arith.constant 0 : i32
    %c0_i32_0 = arith.constant 0 : i32
    %c0_i32_1 = arith.constant 0 : i32
    return %c0_i32, %c0_i32_0 : i32, i32
  }
  func.func @transform_13(%arg0: i32) -> (i32, i32) {
    %c0_i32 = arith.constant 0 : i32
    %c0_i32_0 = arith.constant 0 : i32
    %c0_i32_1 = arith.constant 0 : i32
    return %c0_i32, %c0_i32_0 : i32, i32
  }
  func.func @transform_14(%arg0: i32) -> (i32, i32) {
    %c0_i32 = arith.constant 0 : i32
    %c0_i32_0 = arith.constant 0 : i32
    %c0_i32_1 = arith.constant 0 : i32
    return %c0_i32, %c0_i32_0 : i32, i32
  }
  func.func @transform_15(%arg0: i32) -> (i32, i32) {
    %c0_i32 = arith.constant 0 : i32
    %c0_i32_0 = arith.constant 0 : i32
    %c0_i32_1 = arith.constant 0 : i32
    return %c0_i32, %c0_i32_0 : i32, i32
  }
  func.func @transform_16(%arg0: i32) -> (i32, i32) {
    %c0_i32 = arith.constant 0 : i32
    %c0_i32_0 = arith.constant 0 : i32
    %c0_i32_1 = arith.constant 0 : i32
    return %c0_i32, %c0_i32_0 : i32, i32
  }
  func.func @transform_17(%arg0: i32) -> (i32, i32) {
    %c0_i32 = arith.constant 0 : i32
    %c0_i32_0 = arith.constant 0 : i32
    %c0_i32_1 = arith.constant 0 : i32
    return %c0_i32, %c0_i32_0 : i32, i32
  }
  func.func @transform_18(%arg0: i32) -> (i32, i32) {
    %c0_i32 = arith.constant 0 : i32
    %c0_i32_0 = arith.constant 0 : i32
    %c0_i32_1 = arith.constant 0 : i32
    return %c0_i32, %c0_i32_0 : i32, i32
  }
  func.func @transform_19(%arg0: i32) -> (i32, i32) {
    %c0_i32 = arith.constant 0 : i32
    %c0_i32_0 = arith.constant 0 : i32
    %c0_i32_1 = arith.constant 0 : i32
    return %c0_i32, %c0_i32_0 : i32, i32
  }
  func.func @transform_20(%arg0: i32) -> (i32, i32) {
    %c0_i32 = arith.constant 0 : i32
    %c0_i32_0 = arith.constant 0 : i32
    return %arg0, %c0_i32 : i32, i32
  }
}

</mosaic_0001>

<bundles_post_ra>
// kernel: tpu_custom_call.1
= control target key start
LH: loop header
LB: loop body
LE: loop exit
PB: predicated region body
PF: predicated region fallthrough
CT: control target
= control target key end

     0   :  { %s1602_s0 = inlined_call_operand.hbm [shape: f32[8,8], index: 0, kind: input, shape index: {}]   ;;  %s1603_s1 = inlined_call_operand.hbm [shape: bf16[8,128], index: 1, kind: input, shape index: {}]   ;;  %s1604_s2 = inlined_call_operand.vmem [shape: f32[1,128], index: 2, kind: input, shape index: {}]   ;;  %s1605_s3 = inlined_call_operand.vmem [shape: bf16[128,256], index: 3, kind: input, shape index: {}]   ;;  %s1606_s4 = inlined_call_operand.hbm [shape: f32[1,256], index: 4, kind: input, shape index: {}]   ;;  %s1607_s5 = inlined_call_operand.vmem [shape: bf16[256,16], index: 5, kind: input, shape index: {}]   ;;  %s1608_s6 = inlined_call_operand.hbm [shape: f32[1,16], index: 6, kind: input, shape index: {}]   ;;  %s1609_s7 = inlined_call_operand.vmem [shape: bf16[16,128], index: 7, kind: input, shape index: {}]   ;;  %s1610_s8 = inlined_call_operand.hbm [shape: f32[1,128], index: 8, kind: input, shape index: {}]   ;;  %s1611_s9 = inlined_call_operand.hbm [shape: f32[1,64], index: 9, kind: input, shape index: {}]   ;;  %s1612_s10 = inlined_call_operand.vmem [shape: f32[1,64], index: 10, kind: input, shape index: {}]   ;;  %s1613_s11 = inlined_call_operand.vmem [shape: bf16[64,128], index: 11, kind: input, shape index: {}]   ;;  %s1614_s12 = inlined_call_operand.vmem [shape: f32[1,128], index: 12, kind: input, shape index: {}]   ;;  %s1615_s13 = inlined_call_operand.vmem [shape: f32[1,128], index: 13, kind: input, shape index: {}]   ;;  %s1616_s14 = inlined_call_operand.<no memory space> [shape: f32[1,1], index: 14, kind: input, shape index: {}]   ;;  %s1617_s15 = inlined_call_operand.vmem [shape: bf16[64,128], index: 15, kind: input, shape index: {}]   ;;  %s1618_s16 = inlined_call_operand.vmem [shape: f32[1,128], index: 16, kind: input, shape index: {}]   ;;  %s1619_s17 = inlined_call_operand.vmem [shape: f32[1,128], index: 17, kind: input, shape index: {}]   ;;  %s1620_s18 = inlined_call_operand.vmem [shape: f32[1,128], index: 18, kind: input, shape index: {}]   ;;  %s1621_s19 = inlined_call_operand.vmem [shape: bf16[128,4], index: 19, kind: input, shape index: {}]   ;;  %s1622_s20 = inlined_call_operand.vmem [shape: f32[8,4], index: 20, kind: output, shape index: {}]  }
   0x1   :  { %1624 = sst [smem:[#allocation17_spill]] %s1602_s0  ;;  %v25_v0 = vstv %s1616_s14 }
   0x2   :  { %1625 = sst [smem:[#allocation18_spill]] %s1603_s1  ;;  %26 = vst [vmem:[#allocation2] sm:$0x1] %v25_v0 }
   0x3   :  { %1626 = sst [smem:[#allocation19_spill]] %s1604_s2 }
   0x4   :  { %1627 = sst [smem:[#allocation20_spill]] %s1605_s3 }
   0x5   :  { %1628 = sst [smem:[#allocation21_spill]] %s1606_s4 }
   0x6   :  { %1629 = sst [smem:[#allocation22_spill]] %s1622_s20 }
   0x7   :  { %27 = vsyncpa [#allocation4], 0 }
   0x8   :  { %28 = vsyncpa [#allocation6], 0 }
   0x9   :  { %29 = vsyncpa [#allocation9], 0  ;;  %s1630_s2 = sld [smem:[#allocation18_spill]] }
   0xf   :  { %s47_s25 = sshll.u32 %s1630_s2, 4  ;;  %s48_s25 = int_to_ptr.hbm [resolvable:$true] %s47_s25 }
  0x10   :  { %30 = vsyncpa [#allocation12], 0  ;;  %s1238_s3 = smov [#allocation5]   ;;  %s75_s4 = sshll.u32 %s1608_s6, 4  ;;  %s76_s4 = int_to_ptr.hbm [resolvable:$true] %s75_s4 }
  0x11   :  { %s49_s26 = sshll.u32 %s1238_s3, 4  ;;  %s1239_s14 = smov [#allocation8]   ;;  %s50_s26 = int_to_ptr.vmem [resolvable:$true] %s49_s26 }
  0x12   :  { %52 = dma.hbm_to_vmem [thread:$0]  %s48_s25, 64, %s50_s26, [#allocation6]  }
  0x13   :  { %s77_s29 = sshll.u32 %s1239_s14, 4  ;;  %s1631_s21 = sld [smem:[#allocation17_spill]]  ;;  %s78_s29 = int_to_ptr.vmem [resolvable:$true] %s77_s29 }
  0x14   :  { %80 = dma.hbm_to_vmem [thread:$0]  %s76_s4, 16, %s78_s29, [#allocation9]  }
  0x15   :  { %s1632_s24 = sld [smem:[#allocation21_spill]]  ;;  %s1240_s3 = smov [#allocation3]  }
  0x16   :  { %s38_s20 = sshll.u32 %s1240_s3, 4  ;;  %s1241_s6 = smov [#allocation7]   ;;  %s39_s20 = int_to_ptr.vmem [resolvable:$true] %s38_s20 }
  0x17   :  { %s64_s25 = sshll.u32 %s1241_s6, 4  ;;  %s88_s28 = sshll.u32 %s1610_s8, 4  ;;  %s65_s25 = int_to_ptr.vmem [resolvable:$true] %s64_s25  ;;  %s89_s28 = int_to_ptr.hbm [resolvable:$true] %s88_s28 }
  0x18   :  { %s99_s29 = sshll.u32 %s1611_s9, 4  ;;  %s1242_s30 = smov [#allocation10]   ;;  %s100_s29 = int_to_ptr.hbm [resolvable:$true] %s99_s29 }
  0x19   :  { %s36_s1 = sshll.u32 %s1631_s21, 4  ;;  %s90_s0 = sshll.u32 %s1242_s30, 4  ;;  %s37_s1 = int_to_ptr.hbm [resolvable:$true] %s36_s1  ;;  %s91_s0 = int_to_ptr.vmem [resolvable:$true] %s90_s0 }
  0x1a   :  { %41 = dma.hbm_to_vmem [thread:$0]  %s37_s1, 128, %s39_s20, [#allocation4]  }
  0x1b   :  { %s62_s2 = sshll.u32 %s1632_s24, 4  ;;  %s1243_s21 = smov [#allocation11]   ;;  %s63_s2 = int_to_ptr.hbm [resolvable:$true] %s62_s2 }
  0x1c   :  { %67 = dma.hbm_to_vmem [thread:$0]  %s63_s2, 32, %s65_s25, [#allocation6]  }
  0x1d   :  { %93 = dma.hbm_to_vmem [thread:$0]  %s89_s28, 16, %s91_s0, [#allocation9]  }
  0x1e   :  { %s101_s20 = sshll.u32 %s1243_s21, 4  ;;  %s102_s20 = int_to_ptr.vmem [resolvable:$true] %s101_s20 }
  0x1f   :  { %104 = dma.hbm_to_vmem [thread:$0]  %s100_s29, 16, %s102_s20, [#allocation12]  }
  0x20   :  { %1230 = dma.done.wait [#allocation4], 128  }
  0x21   :  { %1231 = vsyncadd [#allocation4], 4294967168 }
  0x22   :  { %1232 = dma.done.wait [#allocation6], 96  }
  0x23   :  { %1233 = vsyncadd [#allocation6], 4294967200 }
  0x24   :  { %1234 = dma.done.wait [#allocation9], 32  }
  0x25   :  { %1235 = vsyncadd [#allocation9], 4294967264 }
  0x26   :  { %1236 = dma.done.wait [#allocation12], 16  }
  0x27   :  { %1237 = vsyncadd [#allocation12], 4294967280  ;;  %vm161_vm0 = vcmask 1043456   ;;  %v152_v1 = vld [vmem:[#allocation5] sm:$0xf]  ;;  %v150_v2 = vld [vmem:[#allocation3] sm:$0xff] }
  0x28   :  { %s1633_s1 = sld [smem:[#allocation20_spill]]  ;;  %v163_v4 = vsel %vm161_vm0, %v152_v1, 0  ;;  %v151_v5 = vpack.c.bf16 %v150_v2, %v150_v2  ;;  %vm157_vm1 = vcmask 64512   ;;  %v1030_v53 = vld [vmem:[%s1607_s5 + $0x38] sm:$0xff]  ;;  %v1029_v55 = vld [vmem:[%s1607_s5 + $0x30] sm:$0xff]  ;;  %v1028_v57 = vld [vmem:[%s1607_s5 + $0x28] sm:$0xff] }
  0x29   :  { %172 = vmatpush.bf16.msra.mxu1 %v163_v4  ;;  %v1038_v54 = vld [vmem:[%s1607_s5 + $0x78] sm:$0xff]  ;;  %444 = vmatpush.bf16.msra.mxu3 %v1030_v53  ;;  %v1037_v56 = vld [vmem:[%s1607_s5 + $0x70] sm:$0xff]  ;;  %v1036_v58 = vld [vmem:[%s1607_s5 + $0x68] sm:$0xff]  ;;  %s1634_s28 = sld [smem:[#allocation19_spill]]  ;;  %vm484_vm2 = vcmask 130048   ;;  %s1244_s27 = smov 64  }
  0x2a   :  { %457 = vmatpush.bf16.msra.mxu0 %v1038_v54  ;;  %v1027_v59 = vld [vmem:[%s1607_s5 + $0x20] sm:$0xff]  ;;  %v1026_v61 = vld [vmem:[%s1607_s5 + $0x18] sm:$0xff]  ;;  %v1025_v63 = vld [vmem:[%s1607_s5 + $0x10] sm:$0xff]  ;;  %vm539_vm3 = vcmask 523264   ;;  %vm797_vm12 = vcmask 31744   ;;  %s1635_s0 = sld [smem:[#allocation22_spill]] }
  0x2b   :  { %v1035_v60 = vld [vmem:[%s1607_s5 + $0x60] sm:$0xff]  ;;  %v1034_v62 = vld [vmem:[%s1607_s5 + $0x58] sm:$0xff] }
  0x2c   :  { %807 = vmatmul.msk.bf16.vlgmr.msra.gmra.mxu1 %vm157_vm1, %v151_v5 }
  0x2d   :  { %445 = vmatpush.bf16.msra.mxu3 %v1029_v55 }
  0x2e   :  { %v866_v3 = vld [vmem:[%s1633_s1 + $0x70] sm:$0xf]  ;;  %v1022_v6 = vld [vmem:[%s1633_s1 + $0x74] sm:$0xf0]  ;;  %v1021_v7 = vld [vmem:[%s1633_s1 + $0x74] sm:$0xf]  ;;  %458 = vmatpush.bf16.msra.mxu0 %v1037_v56 }
  0x2f   :  { %v867_v8 = vor.u32 %v1022_v6, %v866_v3  ;;  %v868_v9 = vld [vmem:[%s1633_s1 + $0x78] sm:$0xf0]  ;;  %v858_v10 = vld [vmem:[%s1633_s1 + $0x60] sm:$0xf]  ;;  %v1020_v11 = vld [vmem:[%s1633_s1 + $0x64] sm:$0xf0] }
  0x30   :  { %v871_v12 = vor.u32 %v1021_v7, %v868_v9  ;;  %v1019_v13 = vld [vmem:[%s1633_s1 + $0x64] sm:$0xf]  ;;  %v860_v14 = vld [vmem:[%s1633_s1 + $0x68] sm:$0xf0]  ;;  %v859_v15 = vor.u32 %v1020_v11, %v858_v10  ;;  %v850_v17 = vld [vmem:[%s1633_s1 + $0x50] sm:$0xf] }
  0x31   :  { %282 = vmatpush.bf16.msrb.mxu1 %v867_v8  ;;  %v863_v16 = vor.u32 %v1019_v13, %v860_v14  ;;  %v1018_v18 = vld [vmem:[%s1633_s1 + $0x54] sm:$0xf0]  ;;  %v1017_v19 = vld [vmem:[%s1633_s1 + $0x54] sm:$0xf]  ;;  %v852_v20 = vld [vmem:[%s1633_s1 + $0x58] sm:$0xf0]  ;;  %446 = vmatpush.bf16.msra.mxu3 %v1028_v57 }
  0x32   :  { %295 = vmatpush.bf16.msra.mxu2 %v871_v12  ;;  %v851_v21 = vor.u32 %v1018_v18, %v850_v17  ;;  %v842_v22 = vld [vmem:[%s1633_s1 + $0x40] sm:$0xf]  ;;  %v1016_v23 = vld [vmem:[%s1633_s1 + $0x44] sm:$0xf0]  ;;  %v1015_v24 = vld [vmem:[%s1633_s1 + $0x44] sm:$0xf]  ;;  %v855_v25 = vor.u32 %v1017_v19, %v852_v20  ;;  %459 = vmatpush.bf16.msra.mxu0 %v1036_v58 }
  0x33   :  { %v844_v26 = vld [vmem:[%s1633_s1 + $0x48] sm:$0xf0]  ;;  %v843_v27 = vor.u32 %v1016_v23, %v842_v22  ;;  %v834_v29 = vld [vmem:[%s1633_s1 + $0x30] sm:$0xf]  ;;  %v1014_v30 = vld [vmem:[%s1633_s1 + $0x34] sm:$0xf0] }
  0x34   :  { %v847_v28 = vor.u32 %v1015_v24, %v844_v26  ;;  %v1013_v31 = vld [vmem:[%s1633_s1 + $0x34] sm:$0xf]  ;;  %v836_v32 = vld [vmem:[%s1633_s1 + $0x38] sm:$0xf0]  ;;  %v835_v33 = vor.u32 %v1014_v30, %v834_v29  ;;  %v826_v35 = vld [vmem:[%s1633_s1 + $0x20] sm:$0xf] }
  0x35   :  { %283 = vmatpush.bf16.msrb.mxu1 %v859_v15  ;;  %v839_v34 = vor.u32 %v1013_v31, %v836_v32  ;;  %v1012_v36 = vld [vmem:[%s1633_s1 + $0x24] sm:$0xf0]  ;;  %v1011_v37 = vld [vmem:[%s1633_s1 + $0x24] sm:$0xf]  ;;  %v828_v38 = vld [vmem:[%s1633_s1 + $0x28] sm:$0xf0]  ;;  %447 = vmatpush.bf16.msra.mxu3 %v1027_v59 }
  0x36   :  { %296 = vmatpush.bf16.msra.mxu2 %v863_v16  ;;  %v827_v39 = vor.u32 %v1012_v36, %v826_v35  ;;  %v831_v40 = vor.u32 %v1011_v37, %v828_v38  ;;  %v818_v41 = vld [vmem:[%s1633_s1 + $0x10] sm:$0xf]  ;;  %v1010_v42 = vld [vmem:[%s1633_s1 + $0x14] sm:$0xf0]  ;;  %v1009_v43 = vld [vmem:[%s1633_s1 + $0x14] sm:$0xf]  ;;  %460 = vmatpush.bf16.msra.mxu0 %v1035_v60 }
  0x37   :  { %v819_v44 = vor.u32 %v1010_v42, %v818_v41  ;;  %v820_v45 = vld [vmem:[%s1633_s1 + $0x18] sm:$0xf0]  ;;  %v810_v47 = vld [vmem:[%s1633_s1] sm:$0xf]  ;;  %v1008_v48 = vld [vmem:[%s1633_s1 + $0x4] sm:$0xf0] }
  0x38   :  { %v823_v46 = vor.u32 %v1009_v43, %v820_v45  ;;  %v1007_v49 = vld [vmem:[%s1633_s1 + $0x4] sm:$0xf]  ;;  %v811_v50 = vor.u32 %v1008_v48, %v810_v47  ;;  %v812_v51 = vld [vmem:[%s1633_s1 + $0x8] sm:$0xf0]  ;;  %v1067_v0 = vld [vmem:[%s1634_s28] ss:$0 sm:$0xff] }
  0x39   :  { %284 = vmatpush.bf16.msrb.mxu1 %v851_v21  ;;  %v815_v52 = vor.u32 %v1007_v49, %v812_v51  ;;  %448 = vmatpush.bf16.msra.mxu3 %v1026_v61  ;;  %v1024_v6 = vld [vmem:[%s1607_s5 + $0x8] sm:$0xff]  ;;  %v1033_v7 = vld [vmem:[%s1607_s5 + $0x50] sm:$0xff]  ;;  %v1023_v8 = vld [vmem:[%s1607_s5] sm:$0xff]  ;;  %v1245_v48 = vmov 64.0  }
  0x3a   :  { %297 = vmatpush.bf16.msra.mxu2 %v855_v25  ;;  %461 = vmatpush.bf16.msra.mxu0 %v1034_v62  ;;  %v1032_v9 = vld [vmem:[%s1607_s5 + $0x48] sm:$0xff]  ;;  %v1031_v10 = vld [vmem:[%s1607_s5 + $0x40] sm:$0xff]  ;;  %v1043_v25 = vld [vmem:[%s1613_s11 + $0x18] sm:$0xff]  ;;  %1078 = vrcp.f32 %v1245_v48 }
  0x3b   :  { %v1039_v11 = vld [vmem:[%s1609_s7] sm:$0xff]  ;;  %v196_v12 = vld [vmem:[#allocation7] sm:$0x3]  ;;  %v1042_v26 = vld [vmem:[%s1613_s11 + $0x10] sm:$0xff] }
  0x3c   :  { %v198_v13 = vperm.slane %v196_v12, 0  ;;  %v199_v17 = vperm.slane %v196_v12, 1  ;;  %v1041_v36 = vld [vmem:[%s1613_s11 + $0x8] sm:$0xff]  ;;  %v1040_v37 = vld [vmem:[%s1613_s11] sm:$0xff]  ;;  %v1069_v38 = vld [vmem:[#allocation10] ss:$0 sm:$0xff] }
  0x3d   :  { %285 = vmatpush.bf16.msrb.mxu1 %v843_v27  ;;  %449 = vmatpush.bf16.msra.mxu3 %v1025_v63  ;;  %v1068_v27 = vld [vmem:[#allocation8] ss:$0 sm:$0xff]  ;;  %v1072_v59 = vld [vmem:[#allocation11] ss:$0 sm:$0xff]  ;;  %v1073_v60 = vld [vmem:[%s1612_s10] ss:$0 sm:$0xff] }
  0x3e   :  { %298 = vmatpush.bf16.msra.mxu2 %v847_v28  ;;  %462 = vmatpush.bf16.msra.mxu0 %v1033_v7  ;;  %v1070_v61 = vld [vmem:[%s1614_s12] ss:$0 sm:$0xff] }
  0x3f   :  { %610 = vrot.lane.b32.xlu2 %v1072_v59, %s1244_s27  ;;  %v1052_v48 = vld [vmem:[%s1621_s19 + $0x20] sm:$0xff] }
  0x40   :  { %v1079_v49 = vpop.eup %1078 }
  0x41   :  { %286 = vmatpush.bf16.msrb.mxu1 %v835_v33  ;;  %450 = vmatpush.bf16.msra.mxu3 %v1024_v6  ;;  %vm583_vm4 = vweird.f32 %v1079_v49  ;;  %v1047_v6 = vld [vmem:[%s1617_s15 + $0x18] sm:$0xff] }
  0x42   :  { %299 = vmatpush.bf16.msra.mxu2 %v839_v34  ;;  %463 = vmatpush.bf16.msra.mxu0 %v1032_v9  ;;  %v1045_v9 = vld [vmem:[%s1617_s15 + $0x8] sm:$0xff] }
  0x45   :  { %287 = vmatpush.bf16.msrb.mxu1 %v827_v39  ;;  %451 = vmatpush.bf16.msra.mxu3 %v1023_v8  ;;  %v1046_v8 = vld [vmem:[%s1617_s15 + $0x10] sm:$0xff] }
  0x46   :  { %300 = vmatpush.bf16.msra.mxu2 %v831_v40  ;;  %464 = vmatpush.bf16.msra.mxu0 %v1031_v10 }
  0x47   :  { %616 = vrot.lane.b32.xlu2 %v1073_v60, %s1244_s27 }
  0x49   :  { %288 = vmatpush.bf16.msrb.mxu1 %v819_v44  ;;  %668 = vmatpush.bf16.msrb.mxu3 %v1047_v6 }
  0x4a   :  { %301 = vmatpush.bf16.msra.mxu2 %v823_v46 }
  0x4d   :  { %289 = vmatpush.bf16.msrb.mxu1 %v811_v50  ;;  %v579_v50 = vmul.f32 64.0, %v1079_v49  ;;  %669 = vmatpush.bf16.msrb.mxu3 %v1046_v8 }
  0x4e   :  { %302 = vmatpush.bf16.msra.mxu2 %v815_v52 }
  0x4f   :  { %v580_v51 = vsub.f32 1.0, %v579_v50  ;;  %v1050_v50 = vld [vmem:[%s1621_s19 + $0x10] sm:$0xff] }
  0x51   :  { %495 = vmatpush.bf16.msra.mxu1 %v1039_v11  ;;  %v581_v52 = vmul.f32 %v1079_v49, %v580_v51  ;;  %670 = vmatpush.bf16.msrb.mxu3 %v1045_v9  ;;  %v1044_v11 = vld [vmem:[%s1617_s15] sm:$0xff]  ;;  %v1049_v51 = vld [vmem:[%s1621_s19 + $0x8] sm:$0xff] }
  0x52   :  { %547 = vmatpush.bf16.msrb.mxu2 %v1043_v25 }
  0x53   :  { %v582_v53 = vadd.f32 %v1079_v49, %v581_v52  ;;  %v1048_v52 = vld [vmem:[%s1621_s19] sm:$0xff] }
  0x55   :  { %v584_v54 = vsel %vm583_vm4, %v1079_v49, %v582_v53  ;;  %671 = vmatpush.bf16.msrb.mxu3 %v1044_v11  ;;  %v1051_v49 = vld [vmem:[%s1621_s19 + $0x18] sm:$0xff] }
  0x56   :  { %548 = vmatpush.bf16.msrb.mxu2 %v1042_v26  ;;  %v1075_v26 = vld [vmem:[%s1618_s16] ss:$0 sm:$0xff] }
  0x5a   :  { %549 = vmatpush.bf16.msrb.mxu2 %v1041_v36 }
  0x5e   :  { %550 = vmatpush.bf16.msrb.mxu2 %v1040_v37  ;;  %v1055_v37 = vld [vmem:[%s1621_s19 + $0x38] sm:$0xff] }
  0x5f   :  { %784 = vmatpush.bf16.msrb.mxu0 %v1055_v37 }
  0xa9   :  { %v174_v1 = vpop.f32.mrf.mxu1 }
  0xaa   :  { %v175_v2 = vadd.f32 %v1067_v0, %v174_v1 }
  0xac   :  { %v178_v3 = vmax.f32 %v175_v2, 0.0  ;;  %v1071_v2 = vld [vmem:[%s1615_s13] ss:$0 sm:$0xff] }
  0xae   :  { %v179_v4 = vpack.c.bf16 %v178_v3, %v178_v3 }
  0xb0   :  { %290 = vmatmul.bf16.vlgmr.msrb.gmra.mxu1 %v179_v4  ;;  %303 = vmatmul.bf16.vlgmr.msra.gmra.mxu2 %v179_v4 }
  0xb1   :  { %v176_v5 = vpop.f32.mrf.mxu1 }
 0x12d   :  { %v291_v14 = vpop.f32.mrf.mxu1 }
 0x12e   :  { %v292_v15 = vadd.f32 %v291_v14, %v198_v13  ;;  %v611_v14 = vpop.permute.xlu2 %610 }
 0x130   :  { %v308_v16 = vmax.f32 %v292_v15, 0.0 }
 0x132   :  { %v310_v18 = vpack.c.bf16 %v308_v16, %v308_v16 }
 0x133   :  { %v304_v19 = vpop.f32.mrf.mxu2 }
 0x134   :  { %v305_v20 = vadd.f32 %v304_v19, %v199_v17  ;;  %452 = vmatmul.bf16.vlgmr.msra.gmra.mxu3 %v310_v18 }
 0x135   :  { %v293_v21 = vpop.f32.mrf.mxu1 }
 0x136   :  { %v309_v22 = vmax.f32 %v305_v20, 0.0  ;;  %v617_v20 = vpop.permute.xlu2 %616 }
 0x138   :  { %v311_v23 = vpack.c.bf16 %v309_v22, %v309_v22 }
 0x13a   :  { %465 = vmatmul.bf16.vlgmr.msra.gmra.mxu0 %v311_v23 }
 0x13b   :  { %v306_v24 = vpop.f32.mrf.mxu2 }
 0x1b7   :  { %v453_v28 = vpop.f32.mrf.mxu3  ;;  %v466_v29 = vpop.f32.mrf.mxu0 }
 0x1b8   :  { %v454_v30 = vadd.f32 %v1068_v27, %v453_v28 }
 0x1ba   :  { %v467_v31 = vadd.f32 %v466_v29, %v454_v30  ;;  %v1246_v30 = vmov 128.0  }
 0x1bc   :  { %v470_v32 = vmax.f32 %v467_v31, 0.0  ;;  %v1247_v31 = vmov 0  }
 0x1bd   :  { %1066 = vset.pattern.permute.xlu0 %v1247_v31 }
 0x1be   :  { %v471_v33 = vpack.c.bf16 %v470_v32, %v470_v32 }
 0x1bf   :  { %v455_v34 = vpop.f32.mrf.mxu3  ;;  %v468_v35 = vpop.f32.mrf.mxu0 }
 0x1c0   :  { %940 = vmatmul.msk.bf16.vlgmr.msra.gmra.mxu1 %vm484_vm2, %v471_v33 }
 0x23d   :  { %v497_v39 = vpop.f32.mrf.mxu1 }
 0x23e   :  { %v498_v40 = vadd.f32 %v1069_v38, %v497_v39 }
 0x240   :  { %v501_v41 = vmax.f32 %v498_v40, 0.0  ;;  %572 = vrot.lane.b32.xlu0 %v498_v40, %s1244_s27 }
 0x242   :  { %v502_v42 = vpack.c.bf16 %v501_v41, %v501_v41 }
 0x244   :  { %957 = vmatmul.msk.bf16.vlgmr.msrb.gmra.mxu2 %vm539_vm3, %v502_v42 }
 0x245   :  { %v499_v43 = vpop.f32.mrf.mxu1 }
 0x246   :  { %v1074_v43 = vld [vmem:[#allocation2] ss:$0 sm:$0xff] }
 0x2b2   :  { %v573_v44 = vpop.permute.xlu0 %572 }
 0x2b3   :  { %v575_v45 = vsel %vm539_vm3, %v573_v44, 0.0 }
 0x2b4   :  { %576 = vadd.xlane.f32.xlu0 %v575_v45 }
 0x2c7   :  { %v552_v46 = vpop.f32.mrf.mxu2 }
 0x2c8   :  { %v553_v62 = vadd.f32 %v1070_v61, %v552_v46  ;;  %v1054_v46 = vld [vmem:[%s1621_s19 + $0x30] sm:$0xff] }
 0x2c9   :  { %785 = vmatpush.bf16.msrb.mxu0 %v1054_v46 }
 0x2ca   :  { %v556_v1 = vmax.f32 %v553_v62, 0.0  ;;  %v1076_v62 = vld [vmem:[%s1619_s17] ss:$0 sm:$0xff] }
 0x2cc   :  { %v561_v3 = vmul.f32 %v1071_v2, %v556_v1  ;;  %v1077_v1 = vld [vmem:[%s1620_s18] ss:$0 sm:$0xff] }
 0x2cf   :  { %v554_v47 = vpop.f32.mrf.mxu2 }
 0x2d0   :  { %v1053_v47 = vld [vmem:[%s1621_s19 + $0x28] sm:$0xff] }
 0x2d1   :  { %786 = vmatpush.bf16.msrb.mxu0 %v1053_v47 }
 0x2d5   :  { %787 = vmatpush.bf16.msrb.mxu0 %v1052_v48 }
 0x2d9   :  { %788 = vmatpush.bf16.msrb.mxu0 %v1051_v49 }
 0x2dd   :  { %789 = vmatpush.bf16.msrb.mxu0 %v1050_v50 }
 0x2e1   :  { %790 = vmatpush.bf16.msrb.mxu0 %v1049_v51 }
 0x2e5   :  { %791 = vmatpush.bf16.msrb.mxu0 %v1048_v52 }
 0x327   :  { %v577_v55 = vpop.xlane.xlu0 %576 }
 0x328   :  { %v585_v56 = vmul.f32 %v584_v54, %v577_v55 }
 0x32a   :  { %v586_v57 = vsub.f32 %v498_v40, %v585_v56 }
 0x32c   :  { %v587_v58 = vmul.f32 %v586_v57, %v586_v57 }
 0x32e   :  { %589 = vrot.lane.b32.xlu1 %v587_v58, %s1244_s27 }
 0x3a0   :  { %v590_v63 = vpop.permute.xlu1 %589 }
 0x3a1   :  { %v592_v0 = vsel %vm539_vm3, %v590_v63, 0.0 }
 0x3a2   :  { %593 = vadd.xlane.f32.xlu1 %v592_v0 }
 0x3aa   :  { %562 = vadd.xlane.f32.xlu1 %v561_v3 }
 0x415   :  { %v594_v4 = vpop.xlane.xlu1 %593 }
 0x416   :  { %v595_v5 = vmul.f32 %v594_v4, %v584_v54 }
 0x418   :  { %v596_v7 = vadd.f32 1e-05, %v595_v5 }
 0x41a   :  { %1080 = vrsqrt.f32 %v596_v7  ;;  %vm603_vm6 = vweird.f32 %v596_v7 }
 0x41b   :  { %1082 = vrcp.f32 %v1246_v30 }
 0x41d   :  { %v563_v44 = vpop.xlane.xlu1 %562 }
 0x41e   :  { %v568_v45 = vadd.f32 %v1074_v43, %v563_v44 }
 0x420   :  { %v1081_v10 = vpop.eup %1080 }
 0x421   :  { %v598_v12 = vmul.f32 %v1081_v10, %v596_v7  ;;  %vm604_vm5 = vweird.f32 %v1081_v10  ;;  %v1083_v32 = vpop.eup %1082 }
 0x422   :  { %vm605_vm7 = vmor %vm603_vm6, %vm604_vm5  ;;  %v682_v33 = vmul.f32 128.0, %v1083_v32  ;;  %vm686_vm8 = vweird.f32 %v1083_v32 }
 0x423   :  { %v599_v13 = vmul.f32 %v1081_v10, %v598_v12 }
 0x424   :  { %v683_v34 = vsub.f32 1.0, %v682_v33 }
 0x425   :  { %v600_v15 = vmul.f32 0.5, %v599_v13 }
 0x426   :  { %v684_v35 = vmul.f32 %v1083_v32, %v683_v34 }
 0x427   :  { %v601_v16 = vsub.f32 1.5, %v600_v15 }
 0x428   :  { %v685_v36 = vadd.f32 %v1083_v32, %v684_v35 }
 0x429   :  { %v602_v17 = vmul.f32 %v1081_v10, %v601_v16 }
 0x42a   :  { %v687_v38 = vsel %vm686_vm8, %v1083_v32, %v685_v36 }
 0x42b   :  { %v606_v18 = vsel %vm605_vm7, %v1081_v10, %v602_v17 }
 0x42c   :  { %v607_v19 = vmul.f32 %v606_v18, %v586_v57 }
 0x42e   :  { %v613_v21 = vmul.f32 %v611_v14, %v607_v19 }
 0x430   :  { %v619_v22 = vadd.f32 %v617_v20, %v613_v21 }
 0x432   :  { %v620_v23 = vmax.f32 %v619_v22, 0.0 }
 0x434   :  { %v621_v24 = vpack.c.bf16 %v620_v23, %v620_v23 }
 0x436   :  { %635 = vrot.lane.b32.xlu2 %v621_v24, %s1244_s27 }
 0x490   :  { %v636_v25 = vpop.permute.xlu2 %635 }
 0x491   :  { %974 = vmatmul.msk.bf16.vlgmr.msrb.gmra.mxu3 %vm539_vm3, %v636_v25 }
 0x514   :  { %v673_v27 = vpop.f32.mrf.mxu3 }
 0x515   :  { %v674_v28 = vadd.f32 %v1075_v26, %v673_v27 }
 0x517   :  { %679 = vadd.xlane.f32.xlu2 %v674_v28 }
 0x51c   :  { %v675_v29 = vpop.f32.mrf.mxu3 }
 0x58a   :  { %v680_v39 = vpop.xlane.xlu2 %679 }
 0x58b   :  { %v688_v40 = vmul.f32 %v687_v38, %v680_v39 }
 0x58d   :  { %v689_v41 = vsub.f32 %v674_v28, %v688_v40 }
 0x58f   :  { %v690_v42 = vmul.f32 %v689_v41, %v689_v41 }
 0x591   :  { %691 = vadd.xlane.f32.xlu0 %v690_v42 }
 0x5a5   :  { %733 = vperm.xlu0 %1066, %v568_v45  }
 0x604   :  { %v692_v53 = vpop.xlane.xlu0 %691 }
 0x605   :  { %v693_v54 = vmul.f32 %v692_v53, %v687_v38 }
 0x607   :  { %v694_v55 = vadd.f32 1e-05, %v693_v54 }
 0x609   :  { %1084 = vrsqrt.f32 %v694_v55  ;;  %vm701_vm10 = vweird.f32 %v694_v55 }
 0x60f   :  { %v1085_v56 = vpop.eup %1084 }
 0x610   :  { %v696_v57 = vmul.f32 %v1085_v56, %v694_v55  ;;  %vm702_vm9 = vweird.f32 %v1085_v56 }
 0x611   :  { %vm703_vm11 = vmor %vm701_vm10, %vm702_vm9 }
 0x612   :  { %v697_v58 = vmul.f32 %v1085_v56, %v696_v57 }
 0x614   :  { %v698_v59 = vmul.f32 0.5, %v697_v58 }
 0x616   :  { %v699_v60 = vsub.f32 1.5, %v698_v59 }
 0x617   :  { %v734_v5 = vpop.permute.xlu0 %733 }
 0x618   :  { %v700_v61 = vmul.f32 %v1085_v56, %v699_v60 }
 0x61a   :  { %v704_v63 = vsel %vm703_vm11, %v1085_v56, %v700_v61 }
 0x61b   :  { %v705_v0 = vmul.f32 %v704_v63, %v689_v41 }
 0x61d   :  { %v709_v2 = vmul.f32 %v1076_v62, %v705_v0 }
 0x61f   :  { %v713_v3 = vadd.f32 %v1077_v1, %v709_v2 }
 0x621   :  { %v714_v4 = vpack.c.bf16 %v713_v3, %v713_v3 }
 0x623   :  { %792 = vmatmul.bf16.vlgmr.msrb.gmra.mxu0 %v714_v4 }
 0x6a0   :  { %v793_v6 = vpop.f32.mrf.mxu0 }
 0x6a1   :  { %v794_v7 = vadd.f32 %v793_v6, %v734_v5 }
 0x6a3   :  { %798 = vst.msk [vmem:[%s1635_s0] sm:$0xff] %vm797_vm12, %v794_v7 }
 0x6a8   :  { %v795_v8 = vpop.f32.mrf.mxu0 }
 0x6a9   :  { %803 = vsyncpa [#allocation4], 1 }
 0x6aa   :  { %804 = vsyncpa [#allocation6], 1 }
 0x6ab   :  { %805 = vsyncpa [#allocation9], 1 }
 0x6ac   :  { %806 = vsyncpa [#allocation12], 1 }

</bundles_post_ra>
